<compile_context>
chip_gen: v7x
topology: tpu7x:2x2x1
jax: 0.10.0
libtpu: 0.0.40
codegen_flags: <defaults>
</compile_context>

<pallas_src>
import functools

import jax
import jax.numpy as jnp
from jax import lax
from jax.experimental import pallas as pl
from jax.experimental.pallas import tpu as pltpu


def _round_up(x, m):
    return ((x + m - 1) // m) * m


def _vmem_physical_bytes():
    # Generation-aware VMEM capacity (128 MiB on v5e/v6e, 64 MiB per-TC on v7x).
    try:
        cap = getattr(pltpu.get_tpu_info(), "vmem_capacity_bytes", None)
        if cap:
            return int(cap)
    except Exception:
        pass
    return 64 * 1024 * 1024  # conservative fallback (v7x)


_VMEM_PHYSICAL = _vmem_physical_bytes()


def patch_embed_kernel(x_ref, w_ref, add_ref, o_ref):
    # x_ref  : (tn, Kp)  tn = tb*N1p rows = tb whole images (row 0 of each image
    #                    is the all-zero cls row; K zero-padded to lane multiple)
    # w_ref  : (Kp, E)   projection weight, grid-invariant, single-buffered
    # add_ref: (tn, E)   f32 per-row addend (cls+pos0 / bias+pos[n]), grid-invariant
    # o_ref  : (tn, E)   lane-dense output tile
    acc = jnp.dot(
        x_ref[...],
        w_ref[...],
        preferred_element_type=jnp.float32,
        precision=lax.Precision.HIGHEST,
    )
    o_ref[...] = (acc + add_ref[...]).astype(o_ref.dtype)


@functools.partial(jax.jit, static_argnames=("patch_size", "tn_max"))
def patch_embedding_pallas(x, w_conv, b, cls_token, positions, *, patch_size, tn_max=256):
    """x: [B, C, H, W] -> [B, N+1, E]  (N = (H/P)*(W/P)); cls row fused in-kernel."""
    B, C, H, W = x.shape
    P = patch_size
    if H % P != 0 or W % P != 0:
        raise ValueError("spatial dims must be divisible by patch_size")
    E = w_conv.shape[0]
    nh, nw = H // P, W // P
    N = nh * nw
    N1 = N + 1                      # patch tokens + cls token
    K = C * P * P

    itemsize = jnp.dtype(x.dtype).itemsize
    sub = {4: 8, 2: 16, 1: 32}.get(itemsize, 8)   # dtype-aware sublane multiple

    N1p = _round_up(N1, sub)        # tokens per image, sublane-aligned
    Kp = _round_up(K, 128)          # contraction dim, lane-aligned

    # Images per grid step -> ~tn_max rows per MXU call; keep >= 2 grid blocks
    # whenever B >= 2 so both v7x TensorCores get work (use tn_max=128 on v5e).
    tb = max(1, tn_max // N1p)
    tb = min(tb, B)
    if B >= 2:
        tb = min(tb, -(-B // 2))
    num_blocks = -(-B // tb)
    Bp = num_blocks * tb
    tn = tb * N1p                   # rows per grid step (multiple of `sub`)

    # --- patchify (XLA im2col); the transpose fuses with the single pad below -
    patches = x.reshape(B, C, nh, P, nw, P).transpose(0, 2, 4, 1, 3, 5).reshape(B, N, K)
    # One pad: prepend the zero cls row, pad tokens N1->N1p, pad K->Kp, pad B->Bp.
    patches = jnp.pad(patches, ((0, Bp - B), (1, N1p - N1), (0, Kp - K)))
    patches = patches.reshape(Bp * N1p, Kp)        # contiguous -> free reshape

    # conv weight [E, C, P, P] -> [Kp, E] (features on lanes), zero-padded rows.
    w2d = jnp.pad(w_conv.reshape(E, K).T.astype(x.dtype), ((0, Kp - K), (0, 0)))

    # Per-row additive term, kept in f32 (tiny, grid-invariant, fetched once):
    #   row 0            : cls_token + positions[0]
    #   rows 1..N        : conv bias + positions[1..N]
    #   rows N1..N1p-1   : zeros (sliced away)
    cls_row = (cls_token.reshape(1, E) + positions[0, 0:1, :]).astype(jnp.float32)
    tok_rows = (b[None, :] + positions[0, 1:, :]).astype(jnp.float32)
    addend = jnp.concatenate([cls_row, tok_rows], axis=0)          # [N1, E]
    addend = jnp.pad(addend, ((0, N1p - N1), (0, 0)))              # [N1p, E]
    addend = jnp.tile(addend, (tb, 1))                             # [tn, E]

    # --- VMEM budget: 2x-buffered x/out tiles + single weight + single addend --
    est_vmem = (itemsize * (2 * tn * Kp + 2 * tn * E + Kp * E)
                + 4 * tn * E + (2 << 20))
    vmem_cap = int(_VMEM_PHYSICAL * 3 // 4)        # ~48 MiB on v7x, ~96 MiB on v5e/v6e
    vmem_limit = int(min(max(2 * est_vmem, 32 * 1024 * 1024), vmem_cap))

    cost = pl.CostEstimate(
        flops=2 * Bp * N1p * Kp * E,
        transcendentals=0,
        bytes_accessed=int(itemsize * (Bp * N1p * (Kp + E) + Kp * E) + 4 * tn * E),
    )

    out = pl.pallas_call(
        patch_embed_kernel,
        out_shape=jax.ShapeDtypeStruct((Bp * N1p, E), x.dtype),
        grid_spec=pltpu.PrefetchScalarGridSpec(
            num_scalar_prefetch=0,
            grid=(num_blocks,),
            in_specs=[
                pl.BlockSpec((tn, Kp), lambda i: (i, 0)),
                # grid-invariant operands: constant index map + single buffer,
                # so they are DMA'd once and their VMEM footprint is not doubled.
                pl.BlockSpec((Kp, E), lambda i: (0, 0), pipeline_mode=pl.Buffered(1)),
                pl.BlockSpec((tn, E), lambda i: (0, 0), pipeline_mode=pl.Buffered(1)),
            ],
            out_specs=pl.BlockSpec((tn, E), lambda i: (i, 0)),
        ),
        compiler_params=pltpu.CompilerParams(
            dimension_semantics=("parallel",),
            vmem_limit_bytes=vmem_limit,
        ),
        cost_estimate=cost,
    )(patches, w2d, addend)

    out = out.reshape(Bp, N1p, E)
    if Bp != B or N1p != N1:
        out = out[:B, :N1, :]
    return out


def patch_embedding_reference(x, w_conv, b, cls_token, positions, *, patch_size):
    out = lax.conv_general_dilated(
        x, w_conv,
        window_strides=(patch_size, patch_size),
        padding="VALID",
        dimension_numbers=("NCHW", "OIHW", "NCHW"),
        precision=lax.Precision.HIGHEST,
    )
    out = out + b.reshape(1, -1, 1, 1)
    B, E, nh, nw = out.shape
    out = out.transpose(0, 2, 3, 1).reshape(B, nh * nw, E)
    cls = jnp.broadcast_to(cls_token, (B, 1, E))
    return jnp.concatenate([cls, out], axis=1) + positions


if __name__ == "__main__":
    # Small shapes consistent with the module: 16x16 image, patch 8 -> 4 patch
    # tokens, 4 input channels, embed_dim 128 (lane-dense output last dim).
    B, C, IMG, P, E = 2, 4, 16, 8, 128
    N = (IMG // P) ** 2

    key = jax.random.PRNGKey(0)
    kx, kw, kb, kc, kp = jax.random.split(key, 5)

    x = jax.random.normal(kx, (B, C, IMG, IMG), dtype=jnp.float32)
    w_conv = jax.random.normal(kw, (E, C, P, P), dtype=jnp.float32) * 0.02
    b = jax.random.normal(kb, (E,), dtype=jnp.float32) * 0.02
    cls_token = jax.random.uniform(kc, (1, 1, E), dtype=jnp.float32)
    positions = jax.random.uniform(kp, (1, N + 1, E), dtype=jnp.float32)

    out = patch_embedding_pallas(x, w_conv, b, cls_token, positions, patch_size=P)
    out = jax.block_until_ready(out)

    ref = patch_embedding_reference(x, w_conv, b, cls_token, positions, patch_size=P)
    assert out.shape == (B, N + 1, E)
    assert jnp.allclose(out, ref, atol=2e-3, rtol=2e-3), "mismatch vs reference"

    print("KERNEL_OK")
</pallas_src>

<mosaic_0001>
module attributes {stable_mosaic.version = 11 : i64} {
  func.func @patch_embed_kernel(%arg0: i32, %arg1: memref<8x256xf32, #tpu.memory_space<vmem>>, %arg2: memref<256x128xf32, #tpu.memory_space<vmem>>, %arg3: memref<8x128xf32, #tpu.memory_space<vmem>>, %arg4: memref<8x128xf32, #tpu.memory_space<vmem>>) attributes {dimension_semantics = [#tpu.dimension_semantics<parallel>], iteration_bounds = array<i64: 2>, scalar_prefetch = 0 : i64, scratch_operands = 0 : i64, tpu.core_type = #tpu.core_type<tc>, window_params = [{transform_indices = @transform_0, window_bounds = array<i64: 8, 256>}, {pipeline_mode = #tpu.pipeline_mode<synchronous>, transform_indices = @transform_1, window_bounds = array<i64: 256, 128>}, {pipeline_mode = #tpu.pipeline_mode<synchronous>, transform_indices = @transform_2, window_bounds = array<i64: 8, 128>}, {transform_indices = @transform_3, window_bounds = array<i64: 8, 128>}]} {
    %c0 = arith.constant 0 : index
    %c0_0 = arith.constant 0 : index
    %0 = vector.load %arg1[%c0, %c0_0] : memref<8x256xf32, #tpu.memory_space<vmem>>, vector<8x256xf32>
    %c0_1 = arith.constant 0 : index
    %c0_2 = arith.constant 0 : index
    %1 = vector.load %arg2[%c0_1, %c0_2] : memref<256x128xf32, #tpu.memory_space<vmem>>, vector<256x128xf32>
    %cst = arith.constant dense<0.000000e+00> : vector<8x128xf32>
    %2 = tpu.matmul %0, %1, %cst {dimension_numbers = #tpu.dot_dimension_numbers<[1], [0], [0], [1], [0, 0, 1, 1], [], []>, precision = #tpu.contract_precision<fp32>} : vector<8x256xf32>, vector<256x128xf32>, vector<8x128xf32> -> vector<8x128xf32>
    %c0_3 = arith.constant 0 : index
    %c0_4 = arith.constant 0 : index
    %3 = vector.load %arg3[%c0_3, %c0_4] : memref<8x128xf32, #tpu.memory_space<vmem>>, vector<8x128xf32>
    %4 = arith.addf %2, %3 : vector<8x128xf32>
    %c0_5 = arith.constant 0 : index
    %c0_6 = arith.constant 0 : index
    %5 = vector.load %arg4[%c0_5, %c0_6] : memref<8x128xf32, #tpu.memory_space<vmem>>, vector<8x128xf32>
    tpu.vector_store %arg4[%c0_5, %c0_6], %4 {strides = array<i32>} : memref<8x128xf32, #tpu.memory_space<vmem>>, vector<8x128xf32>,
    return
  }
  func.func @transform_0(%arg0: i32) -> (i32, i32) {
    %c0_i32 = arith.constant 0 : i32
    %c0_i32_0 = arith.constant 0 : i32
    return %arg0, %c0_i32 : i32, i32
  }
  func.func @transform_1(%arg0: i32) -> (i32, i32) {
    %c0_i32 = arith.constant 0 : i32
    %c0_i32_0 = arith.constant 0 : i32
    %c0_i32_1 = arith.constant 0 : i32
    return %c0_i32, %c0_i32_0 : i32, i32
  }
  func.func @transform_2(%arg0: i32) -> (i32, i32) {
    %c0_i32 = arith.constant 0 : i32
    %c0_i32_0 = arith.constant 0 : i32
    %c0_i32_1 = arith.constant 0 : i32
    return %c0_i32, %c0_i32_0 : i32, i32
  }
  func.func @transform_3(%arg0: i32) -> (i32, i32) {
    %c0_i32 = arith.constant 0 : i32
    %c0_i32_0 = arith.constant 0 : i32
    return %arg0, %c0_i32 : i32, i32
  }
}

</mosaic_0001>

<bundles_post_ra>
// kernel: patch_embedding_pallas.1
= control target key start
LH: loop header
LB: loop body
LE: loop exit
PB: predicated region body
PF: predicated region fallthrough
CT: control target
= control target key end

     0   :  { %s1569_s12 = smov 0   ;;  %s2097_s0 = inlined_call_operand.vmem [shape: f32[16,256], index: 0, kind: input, shape index: {}]   ;;  %s2098_s1 = inlined_call_operand.vmem [shape: f32[256,128], index: 1, kind: input, shape index: {}]   ;;  %s2099_s2 = inlined_call_operand.vmem [shape: f32[8,128], index: 2, kind: input, shape index: {}]   ;;  %s2100_s3 = inlined_call_operand.vmem [shape: f32[16,128], index: 3, kind: output, shape index: {}]  }
   0x1 LB: > { %s1120_s13 = sadd.s32 4294967295, %s1547_s12   ;;  %p1124_p0 = scmp.ge.s32.totalorder %s1547_s12, 1  ;;  %s1547_s12 = sphi %s1569_s12, %s13_s12  }
   0x2   : > { %p137_p1 = scmp.lt.s32.totalorder %s1547_s12, 3 }
   0x4   : > { %p138_p2 = pnand %p1124_p0, %p137_p1 }
   0x6   : > { %141 = sbr.rel (%p138_p2) target bundleno = 356 (0x164), region = 32 }
   0xd   : > { %v187_v0 = vld [vmem:[%s2098_s1 + $0x80] sm:$0xff]  ;;  %v188_v1 = vld [vmem:[%s2098_s1 + $0x88] sm:$0xff]  ;;  %v189_v7 = vld [vmem:[%s2098_s1 + $0x90] sm:$0xff]  ;;  %p1769_p3 = scmp.lt.s32.totalorder %s1120_s13, 1 }
   0xe   : > { %v171_v2 = vld [vmem:[%s2098_s1] sm:$0xff]  ;;  %v253_v3 = vand.u32 4294901760, %v187_v0  ;;  %v256_v4 = vand.u32 4294901760, %v188_v1  ;;  %v172_v5 = vld [vmem:[%s2098_s1 + $0x8] sm:$0xff]  ;;  %v190_v8 = vld [vmem:[%s2098_s1 + $0x98] sm:$0xff]  ;;  %v259_v10 = vand.u32 4294901760, %v189_v7 }
   0xf   : > { %v205_v6 = vand.u32 4294901760, %v171_v2  ;;  %v208_v9 = vand.u32 4294901760, %v172_v5  ;;  %v262_v11 = vand.u32 4294901760, %v190_v8  ;;  %v173_v12 = vld [vmem:[%s2098_s1 + $0x10] sm:$0xff]  ;;  %v174_v13 = vld [vmem:[%s2098_s1 + $0x18] sm:$0xff]  ;;  %v191_v18 = vld [vmem:[%s2098_s1 + $0xa0] sm:$0xff] }
  0x10   : > { %v1601_v14 = vpack.c.bf16 %v256_v4, %v253_v3  ;;  %v211_v16 = vand.u32 4294901760, %v173_v12  ;;  %v214_v17 = vand.u32 4294901760, %v174_v13  ;;  %v192_v19 = vld [vmem:[%s2098_s1 + $0xa8] sm:$0xff]  ;;  %v175_v23 = vld [vmem:[%s2098_s1 + $0x20] sm:$0xff]  ;;  %v1624_v25 = vsub.f32 %v189_v7, %v259_v10  ;;  %v193_v37 = vld [vmem:[%s2098_s1 + $0xb0] sm:$0xff]  ;;  %s2191_s13 = smov (!%p1769_p3, %s1120_s13), 1 }
  0x11   : > { %v1603_v15 = vsub.f32 %v171_v2, %v205_v6  ;;  %v1611_v20 = vpack.c.bf16 %v208_v9, %v205_v6  ;;  %v1613_v21 = vsub.f32 %v172_v5, %v208_v9  ;;  %v1615_v22 = vpack.c.bf16 %v262_v11, %v259_v10  ;;  %v176_v24 = vld [vmem:[%s2098_s1 + $0x28] sm:$0xff]  ;;  %v194_v42 = vld [vmem:[%s2098_s1 + $0xb8] sm:$0xff]  ;;  %v177_v55 = vld [vmem:[%s2098_s1 + $0x30] sm:$0xff]  ;;  %s1130_s25 = sshll.u32 %s2191_s13, 4  ;;  %s1127_s8 = sshll.u32 %s2191_s13, 3 }
  0x12   : > { %1342 = vmatprep.subr.bf16.mxu0 %v1601_v14  ;;  %v1626_v26 = vsub.f32 %v190_v8, %v262_v11  ;;  %v1628_v27 = vpack.c.bf16 %v214_v17, %v211_v16  ;;  %v1630_v28 = vsub.f32 %v173_v12, %v211_v16  ;;  %v265_v29 = vand.u32 4294901760, %v191_v18  ;;  %v178_v56 = vld [vmem:[%s2098_s1 + $0x38] sm:$0xff]  ;;  %v195_v5 = vld [vmem:[%s2098_s1 + $0xc0] sm:$0xff]  ;;  %v196_v6 = vld [vmem:[%s2098_s1 + $0xc8] sm:$0xff]  ;;  %s164_s5 = scalar_lea.vmem %s2097_s0, %s1130_s25  ;;  %s168_s11 = scalar_lea.vmem %s2100_s3, %s1127_s8 }
  0x13   : > { %1344 = vmatpush3.bf16.msra.mxu0 %v1611_v20  ;;  %v268_v30 = vand.u32 4294901760, %v192_v19  ;;  %v1633_v31 = vsub.f32 %v187_v0, %v253_v3  ;;  %v1635_v32 = vsub.f32 %v188_v1, %v256_v4  ;;  %v217_v33 = vand.u32 4294901760, %v175_v23  ;;  %v179_v11 = vld [vmem:[%s2098_s1 + $0x40] sm:$0xff] }
  0x14   : > { %1346 = vmatprep.subr.bf16.mxu0 %v1615_v22  ;;  %v220_v34 = vand.u32 4294901760, %v176_v24  ;;  %v2118_v35 = vand.u32 4294901760, %v1603_v15  ;;  %v2117_v36 = vand.u32 4294901760, %v1613_v21  ;;  %v1643_v38 = vsub.f32 %v174_v13, %v214_v17 }
  0x15   : > { %v1645_v39 = vpack.c.bf16 %v268_v30, %v265_v29  ;;  %v1647_v40 = vsub.f32 %v191_v18, %v265_v29  ;;  %v2120_v41 = vand.u32 4294901760, %v1633_v31  ;;  %v1653_v43 = vsub.f32 %v192_v19, %v268_v30  ;;  %v180_v29 = vld [vmem:[%s2098_s1 + $0x48] sm:$0xff] }
  0x16   : > { %v2119_v44 = vand.u32 4294901760, %v1635_v32  ;;  %v1656_v45 = vpack.c.bf16 %v220_v34, %v217_v33  ;;  %v1658_v46 = vsub.f32 %v175_v23, %v217_v33  ;;  %v320_v48 = vsub.f32 %v1603_v15, %v2118_v35 }
  0x17   : > { %1348 = vmatpush3.bf16.msra.mxu0 %v1628_v27  ;;  %v432_v47 = vsub.f32 %v1633_v31, %v2120_v41  ;;  %v327_v49 = vsub.f32 %v1613_v21, %v2117_v36  ;;  %v271_v50 = vand.u32 4294901760, %v193_v37  ;;  %v274_v52 = vand.u32 4294901760, %v194_v42  ;;  %v169_v41 = vld [vmem:[%s164_s5] sm:$0xff] }
  0x18   : > { %1350 = vmatprep.subr.bf16.mxu0 %v1645_v39  ;;  %v439_v51 = vsub.f32 %v1635_v32, %v2119_v44  ;;  %v2116_v53 = vand.u32 4294901760, %v1624_v25  ;;  %v2113_v54 = vand.u32 4294901760, %v1626_v26  ;;  %v1682_v58 = vsub.f32 %v176_v24, %v220_v34 }
  0x19   : > { %v433_v57 = vand.u32 4294901760, %v432_v47  ;;  %v321_v59 = vand.u32 4294901760, %v320_v48  ;;  %v328_v60 = vand.u32 4294901760, %v327_v49  ;;  %v1684_v62 = vpack.c.bf16 %v274_v52, %v271_v50 }
  0x1a   : > { %v440_v61 = vand.u32 4294901760, %v439_v51  ;;  %v1686_v63 = vsub.f32 %v193_v37, %v271_v50  ;;  %v446_v0 = vsub.f32 %v1624_v25, %v2116_v53  ;;  %v453_v2 = vsub.f32 %v1626_v26, %v2113_v54 }
  0x1b   : > { %1352 = vmatpush3.bf16.msra.mxu0 %v1656_v45  ;;  %v1375_v1 = vpack.c.bf16 %v328_v60, %v321_v59  ;;  %v223_v3 = vand.u32 4294901760, %v177_v55  ;;  %v226_v4 = vand.u32 4294901760, %v178_v56  ;;  %v2112_v9 = vand.u32 4294901760, %v1630_v28 }
  0x1c   : > { %v1373_v7 = vpack.c.bf16 %v440_v61, %v433_v57  ;;  %1354 = vmatprep.subr.bf16.mxu0 %v1684_v62  ;;  %v447_v8 = vand.u32 4294901760, %v446_v0  ;;  %v2109_v10 = vand.u32 4294901760, %v1643_v38  ;;  %v1707_v12 = vsub.f32 %v194_v42, %v274_v52  ;;  %v198_v57 = vld [vmem:[%s2098_s1 + $0xd8] sm:$0xff] }
  0x1d   : > { %v454_v13 = vand.u32 4294901760, %v453_v2  ;;  %v1709_v16 = vpack.c.bf16 %v226_v4, %v223_v3  ;;  %v1711_v17 = vsub.f32 %v177_v55, %v223_v3  ;;  %v334_v18 = vsub.f32 %v1630_v28, %v2112_v9 }
  0x1e   : > { %1374 = vmatprep.subr.bf16.mxu1 %v1373_v7  ;;  %v341_v19 = vsub.f32 %v1643_v38, %v2109_v10  ;;  %v277_v23 = vand.u32 4294901760, %v195_v5  ;;  %v280_v24 = vand.u32 4294901760, %v196_v6  ;;  %v2108_v33 = vand.u32 4294901760, %v1647_v40 }
  0x1f   : > { %1376 = vmatpush3.bf16.msra.mxu1 %v1375_v1  ;;  %v1377_v30 = vpack.c.bf16 %v454_v13, %v447_v8  ;;  %1356 = vmatpush3.bf16.msra.mxu0 %v1709_v16  ;;  %v2106_v34 = vand.u32 4294901760, %v1653_v43  ;;  %v229_v37 = vand.u32 4294901760, %v179_v11  ;;  %v1725_v42 = vsub.f32 %v178_v56, %v226_v4  ;;  %v197_v56 = vld [vmem:[%s2098_s1 + $0xd0] sm:$0xff] }
  0x20   : > { %v335_v47 = vand.u32 4294901760, %v334_v18  ;;  %v342_v48 = vand.u32 4294901760, %v341_v19  ;;  %v1727_v49 = vpack.c.bf16 %v280_v24, %v277_v23  ;;  %v1729_v50 = vsub.f32 %v195_v5, %v277_v23  ;;  %v181_v1 = vld [vmem:[%s2098_s1 + $0x50] sm:$0xff]  ;;  %v182_v18 = vld [vmem:[%s2098_s1 + $0x58] sm:$0xff] }
  0x21   : > { %1378 = vmatprep.subr.bf16.mxu1 %v1377_v30  ;;  %v460_v51 = vsub.f32 %v1647_v40, %v2108_v33  ;;  %v467_v52 = vsub.f32 %v1653_v43, %v2106_v34  ;;  %v232_v55 = vand.u32 4294901760, %v180_v29  ;;  %v1744_v60 = vsub.f32 %v196_v6, %v280_v24 }
  0x22   : > { %v1379_v59 = vpack.c.bf16 %v342_v48, %v335_v47  ;;  %1358 = vmatprep.subr.bf16.mxu0 %v1727_v49  ;;  %v2105_v61 = vand.u32 4294901760, %v1658_v46  ;;  %v2103_v0 = vand.u32 4294901760, %v1682_v58  ;;  %v1753_v5 = vsub.f32 %v179_v11, %v229_v37 }
  0x23   : > { %v461_v2 = vand.u32 4294901760, %v460_v51  ;;  %v468_v3 = vand.u32 4294901760, %v467_v52  ;;  %v1751_v4 = vpack.c.bf16 %v232_v55, %v229_v37  ;;  %v283_v8 = vand.u32 4294901760, %v197_v56 }
  0x24   : > { %1380 = vmatpush3.bf16.msra.mxu1 %v1379_v59  ;;  %v348_v6 = vsub.f32 %v1658_v46, %v2105_v61  ;;  %v355_v7 = vsub.f32 %v1682_v58, %v2103_v0  ;;  %v286_v13 = vand.u32 4294901760, %v198_v57  ;;  %v2102_v11 = vand.u32 4294901760, %v1686_v63 }
  0x25   : > { %v1381_v19 = vpack.c.bf16 %v468_v3, %v461_v2  ;;  %1360 = vmatpush3.bf16.msra.mxu0 %v1751_v4  ;;  %v2101_v23 = vand.u32 4294901760, %v1707_v12  ;;  %v235_v24 = vand.u32 4294901760, %v181_v1  ;;  %v1773_v30 = vsub.f32 %v180_v29, %v232_v55  ;;  %v199_v29 = vld [vmem:[%s2098_s1 + $0xe0] sm:$0xff]  ;;  %v200_v55 = vld [vmem:[%s2098_s1 + $0xe8] sm:$0xff] }
  0x26   : > { %v349_v37 = vand.u32 4294901760, %v348_v6  ;;  %v356_v47 = vand.u32 4294901760, %v355_v7  ;;  %v1775_v48 = vpack.c.bf16 %v286_v13, %v283_v8  ;;  %v1777_v51 = vsub.f32 %v197_v56, %v283_v8  ;;  %v183_v8 = vld [vmem:[%s2098_s1 + $0x60] sm:$0xff] }
  0x27   : > { %1382 = vmatprep.subr.bf16.mxu1 %v1381_v19  ;;  %v474_v52 = vsub.f32 %v1686_v63, %v2102_v11  ;;  %v481_v59 = vsub.f32 %v1707_v12, %v2101_v23  ;;  %v238_v2 = vand.u32 4294901760, %v182_v18  ;;  %v1792_v3 = vsub.f32 %v198_v57, %v286_v13 }
  0x28   : > { %v1383_v56 = vpack.c.bf16 %v356_v47, %v349_v37  ;;  %1362 = vmatprep.subr.bf16.mxu0 %v1775_v48  ;;  %v2104_v6 = vand.u32 4294901760, %v1711_v17  ;;  %v2107_v7 = vand.u32 4294901760, %v1725_v42  ;;  %v1801_v0 = vsub.f32 %v181_v1, %v235_v24  ;;  %v184_v1 = vld [vmem:[%s2098_s1 + $0x68] sm:$0xff] }
  0x29   : > { %v475_v19 = vand.u32 4294901760, %v474_v52  ;;  %v482_v23 = vand.u32 4294901760, %v481_v59  ;;  %v1799_v11 = vpack.c.bf16 %v238_v2, %v235_v24  ;;  %v289_v37 = vand.u32 4294901760, %v199_v29 }
  0x2a   : > { %1384 = vmatpush3.bf16.msra.mxu1 %v1383_v56  ;;  %v362_v57 = vsub.f32 %v1711_v17, %v2104_v6  ;;  %v369_v13 = vsub.f32 %v1725_v42, %v2107_v7  ;;  %v292_v47 = vand.u32 4294901760, %v200_v55  ;;  %v2111_v52 = vand.u32 4294901760, %v1729_v50 }
  0x2b   : > { %v1385_v24 = vpack.c.bf16 %v482_v23, %v475_v19  ;;  %1364 = vmatpush3.bf16.msra.mxu0 %v1799_v11  ;;  %v2110_v59 = vand.u32 4294901760, %v1744_v60  ;;  %v241_v56 = vand.u32 4294901760, %v183_v8  ;;  %v1821_v6 = vsub.f32 %v182_v18, %v238_v2  ;;  %v201_v18 = vld [vmem:[%s2098_s1 + $0xf0] sm:$0xff]  ;;  %v202_v2 = vld [vmem:[%s2098_s1 + $0xf8] sm:$0xff] }
  0x2c   : > { %v363_v61 = vand.u32 4294901760, %v362_v57  ;;  %v370_v34 = vand.u32 4294901760, %v369_v13  ;;  %v1823_v7 = vpack.c.bf16 %v292_v47, %v289_v37  ;;  %v1825_v33 = vsub.f32 %v199_v29, %v289_v37 }
  0x2d   : > { %1386 = vmatprep.subr.bf16.mxu1 %v1385_v24  ;;  %v488_v23 = vsub.f32 %v1729_v50, %v2111_v52  ;;  %v495_v19 = vsub.f32 %v1744_v60, %v2110_v59  ;;  %v244_v10 = vand.u32 4294901760, %v184_v1  ;;  %v1841_v57 = vsub.f32 %v200_v55, %v292_v47  ;;  %v185_v24 = vld [vmem:[%s2098_s1 + $0x70] sm:$0xff] }
  0x2e   : > { %v1387_v29 = vpack.c.bf16 %v370_v34, %v363_v61  ;;  %1366 = vmatprep.subr.bf16.mxu0 %v1823_v7  ;;  %v2114_v13 = vand.u32 4294901760, %v1753_v5  ;;  %v2115_v37 = vand.u32 4294901760, %v1773_v30  ;;  %v1850_v54 = vsub.f32 %v183_v8, %v241_v56 }
  0x2f   : > { %v489_v59 = vand.u32 4294901760, %v488_v23  ;;  %v496_v52 = vand.u32 4294901760, %v495_v19  ;;  %v1848_v9 = vpack.c.bf16 %v244_v10, %v241_v56  ;;  %v295_v55 = vand.u32 4294901760, %v201_v18  ;;  %v186_v23 = vld [vmem:[%s2098_s1 + $0x78] sm:$0xff] }
  0x30   : > { %1388 = vmatpush3.bf16.msra.mxu1 %v1387_v29  ;;  %v376_v34 = vsub.f32 %v1753_v5, %v2114_v13  ;;  %v383_v61 = vsub.f32 %v1773_v30, %v2115_v37  ;;  %v298_v47 = vand.u32 4294901760, %v202_v2  ;;  %v2123_v56 = vand.u32 4294901760, %v1777_v51 }
  0x31   : > { %2146 = vst [vmem:[#allocation2_spill] sm:$0xff] %v1848_v9  ;;  %v1389_v8 = vpack.c.bf16 %v496_v52, %v489_v59  ;;  %1368 = vmatpush3.bf16.msra.mxu0 %v1848_v9  ;;  %v2124_v19 = vand.u32 4294901760, %v1792_v3  ;;  %v247_v29 = vand.u32 4294901760, %v185_v24  ;;  %v1867_v13 = vsub.f32 %v184_v1, %v244_v10  ;;  %v170_v9 = vld [vmem:[%s164_s5 + $0x8] sm:$0xff] }
  0x32   : > { %v377_v37 = vand.u32 4294901760, %v376_v34  ;;  %v384_v53 = vand.u32 4294901760, %v383_v61  ;;  %v1869_v36 = vpack.c.bf16 %v298_v47, %v295_v55  ;;  %v1871_v35 = vsub.f32 %v201_v18, %v295_v55 }
  0x33   : > { %1390 = vmatprep.subr.bf16.mxu1 %v1389_v8  ;;  %v502_v52 = vsub.f32 %v1777_v51, %v2123_v56  ;;  %v509_v59 = vsub.f32 %v1792_v3, %v2124_v19  ;;  %v250_v44 = vand.u32 4294901760, %v186_v23  ;;  %v1880_v1 = vsub.f32 %v202_v2, %v298_v47 }
  0x34   : > { %2147 = vst [vmem:[#allocation3_spill] sm:$0xff] %v1869_v36  ;;  %v1391_v10 = vpack.c.bf16 %v384_v53, %v377_v37  ;;  %1370 = vmatprep.subr.bf16.mxu0 %v1869_v36  ;;  %v2125_v34 = vand.u32 4294901760, %v1801_v0  ;;  %v2126_v18 = vand.u32 4294901760, %v1821_v6  ;;  %v1886_v56 = vsub.f32 %v185_v24, %v247_v29 }
  0x35   : > { %v503_v61 = vand.u32 4294901760, %v502_v52  ;;  %v510_v55 = vand.u32 4294901760, %v509_v59  ;;  %v1884_v8 = vpack.c.bf16 %v250_v44, %v247_v29  ;;  %v1894_v2 = vand.u32 4294901760, %v170_v9 }
  0x36   : > { %1392 = vmatpush3.bf16.msra.mxu1 %v1391_v10  ;;  %v390_v19 = vsub.f32 %v1801_v0, %v2125_v34  ;;  %v397_v53 = vsub.f32 %v1821_v6, %v2126_v18  ;;  %v1896_v37 = vand.u32 4294901760, %v169_v41  ;;  %v2133_v52 = vand.u32 4294901760, %v1825_v33 }
  0x37   : > { %2148 = vst [vmem:[#allocation4_spill] sm:$0xff] %v1884_v8  ;;  %2149 = vst [vmem:[#allocation5_spill] sm:$0xff] %v1894_v2  ;;  %v1393_v47 = vpack.c.bf16 %v510_v55, %v503_v61  ;;  %1372 = vmatpush3.bf16.msra.mxu0 %v1884_v8  ;;  %v2135_v24 = vand.u32 4294901760, %v1841_v57  ;;  %v1405_v29 = vpack.c.bf16 %v1635_v32, %v1633_v31  ;;  %541 = vmatprep.mubr.f32.mxu1 %v1894_v2 }
  0x38   : > { %v391_v59 = vand.u32 4294901760, %v390_v19  ;;  %v398_v10 = vand.u32 4294901760, %v397_v53  ;;  %v1904_v34 = vsub.f32 %v170_v9, %v1894_v2  ;;  %v1907_v18 = vsub.f32 %v169_v41, %v1896_v37 }
  0x39   : > { %1394 = vmatprep.subr.bf16.mxu1 %v1393_v47  ;;  %v516_v61 = vsub.f32 %v1825_v33, %v2133_v52  ;;  %v523_v55 = vsub.f32 %v1841_v57, %v2135_v24  ;;  %1406 = vmatprep.subr.bf16.mxu0 %v1405_v29  ;;  %v2134_v19 = vand.u32 4294901760, %v1850_v54  ;;  %v2136_v9 = vand.u32 4294901760, %v1867_v13 }
  0x3a   : > { %2150 = vst [vmem:[#allocation6_spill] sm:$0xff] %v1907_v18  ;;  %v1918_v53 = vsub.f32 %v186_v23, %v250_v44  ;;  %v1395_v41 = vpack.c.bf16 %v398_v10, %v391_v59  ;;  %v2137_v8 = vand.u32 4294901760, %v1904_v34  ;;  %v2138_v47 = vand.u32 4294901760, %v1907_v18 }
  0x3b   : > { %v517_v36 = vand.u32 4294901760, %v516_v61  ;;  %v524_v2 = vand.u32 4294901760, %v523_v55  ;;  %v404_v52 = vsub.f32 %v1850_v54, %v2134_v19  ;;  %v411_v29 = vsub.f32 %v1867_v13, %v2136_v9 }
  0x3c   : > { %1396 = vmatpush3.bf16.msra.mxu1 %v1395_v41  ;;  %v303_v44 = vsub.f32 %v1904_v34, %v2137_v8  ;;  %v309_v23 = vsub.f32 %v1907_v18, %v2138_v47  ;;  %v2144_v59 = vand.u32 4294901760, %v1871_v35  ;;  %v2141_v10 = vand.u32 4294901760, %v1880_v1 }
  0x3d   : > { %v1397_v61 = vpack.c.bf16 %v524_v2, %v517_v36  ;;  %v405_v55 = vand.u32 4294901760, %v404_v52  ;;  %v412_v19 = vand.u32 4294901760, %v411_v29  ;;  %v1407_v24 = vpack.c.bf16 %v1613_v21, %v1603_v15 }
  0x3e   : > { %v304_v9 = vand.u32 4294901760, %v303_v44  ;;  %v310_v41 = vand.u32 4294901760, %v309_v23  ;;  %v530_v8 = vsub.f32 %v1871_v35, %v2144_v59  ;;  %v537_v47 = vsub.f32 %v1880_v1, %v2141_v10 }
  0x3f   : > { %1398 = vmatprep.subr.bf16.mxu1 %v1397_v61  ;;  %v1399_v18 = vpack.c.bf16 %v412_v19, %v405_v55  ;;  %v1409_v36 = vpack.c.bf16 %v1626_v26, %v1624_v25  ;;  %v2143_v2 = vand.u32 4294901760, %v1886_v56  ;;  %v2142_v52 = vand.u32 4294901760, %v1918_v53 }
  0x40   : > { %305 = vmatprep.mubr.f32.mxu0 %v304_v9  ;;  %v531_v29 = vand.u32 4294901760, %v530_v8  ;;  %v538_v44 = vand.u32 4294901760, %v537_v47  ;;  %v1411_v55 = vpack.c.bf16 %v1643_v38, %v1630_v28  ;;  %v1413_v8 = vpack.c.bf16 %v1653_v43, %v1647_v40 }
  0x41   : > { %311 = vmatmul.mubr.f32.vlgmr.msra.gmra.mrb[0].mxu0 %v310_v41  ;;  %1400 = vmatpush3.bf16.msra.mxu1 %v1399_v18  ;;  %v418_v23 = vsub.f32 %v1886_v56, %v2143_v2  ;;  %v425_v19 = vsub.f32 %v1918_v53, %v2142_v52  ;;  %v1415_v18 = vpack.c.bf16 %v1682_v58, %v1658_v46  ;;  %v2151_v41 = vand.u32 4294901760, %v1633_v31 }
  0x42   : > { %1408 = vmatpush3.bf16.msra.mxu0 %v1407_v24  ;;  %v1401_v61 = vpack.c.bf16 %v538_v44, %v531_v29  ;;  %678 = vmatprep.mubr.f32.mxu0 %v1904_v34  ;;  %v1417_v47 = vpack.c.bf16 %v1707_v12, %v1686_v63  ;;  %v2152_v29 = vand.u32 4294901760, %v1635_v32  ;;  %v2153_v44 = vand.u32 4294901760, %v1603_v15 }
  0x43   : > { %1410 = vmatprep.subr.bf16.mxu0 %v1409_v36  ;;  %v419_v10 = vand.u32 4294901760, %v418_v23  ;;  %v426_v9 = vand.u32 4294901760, %v425_v19  ;;  %v2154_v23 = vand.u32 4294901760, %v1613_v21  ;;  %v2155_v52 = vand.u32 4294901760, %v1624_v25 }
  0x44   : > { %1402 = vmatprep.subr.bf16.mxu1 %v1401_v61  ;;  %v1469_v36 = vpack.c.bf16 %v2152_v29, %v2151_v41  ;;  %v2156_v61 = vand.u32 4294901760, %v1626_v26  ;;  %v2157_v59 = vand.u32 4294901760, %v1630_v28  ;;  %v2159_v31 = vand.u32 4294901760, %v1647_v40 }
  0x45   : > { %v1403_v24 = vpack.c.bf16 %v426_v9, %v419_v10  ;;  %v1471_v19 = vpack.c.bf16 %v2154_v23, %v2153_v44  ;;  %v2158_v10 = vand.u32 4294901760, %v1643_v38  ;;  %v2160_v32 = vand.u32 4294901760, %v1653_v43  ;;  %v2175_v23 = vld [vmem:[#allocation3_spill] sm:$0xff] }
  0x46   : > { %v1473_v2 = vpack.c.bf16 %v2156_v61, %v2155_v52  ;;  %1412 = vmatpush3.bf16.msra.mxu0 %v1411_v55  ;;  %v2161_v15 = vand.u32 4294901760, %v1658_v46  ;;  %v2162_v21 = vand.u32 4294901760, %v1682_v58  ;;  %v2163_v25 = vand.u32 4294901760, %v1686_v63  ;;  %v2176_v61 = vld [vmem:[#allocation4_spill] sm:$0xff] }
  0x47   : > { %v1475_v9 = vpack.c.bf16 %v2158_v10, %v2157_v59  ;;  %v1477_v41 = vpack.c.bf16 %v2160_v32, %v2159_v31  ;;  %v2164_v26 = vand.u32 4294901760, %v1707_v12  ;;  %1404 = vmatpush3.bf16.msra.mxu1 %v1403_v24  ;;  %1414 = vmatprep.subr.bf16.mxu0 %v1413_v8  ;;  %v2165_v28 = vand.u32 4294901760, %v1711_v17 }
  0x48   : > { %v1479_v29 = vpack.c.bf16 %v2162_v21, %v2161_v15  ;;  %v2166_v38 = vand.u32 4294901760, %v1725_v42  ;;  %v2167_v43 = vand.u32 4294901760, %v1729_v50  ;;  %v2168_v59 = vand.u32 4294901760, %v1744_v60  ;;  %1438 = vmatprep.subr.bf16.mxu1 %v1601_v14 }
  0x49   : > { %v1481_v52 = vpack.c.bf16 %v2164_v26, %v2163_v25  ;;  %v2169_v58 = vand.u32 4294901760, %v1753_v5  ;;  %v2170_v55 = vand.u32 4294901760, %v1773_v30  ;;  %v1419_v12 = vpack.c.bf16 %v1725_v42, %v1711_v17 }
  0x4a   : > { %v1483_v40 = vpack.c.bf16 %v2166_v38, %v2165_v28  ;;  %v1485_v46 = vpack.c.bf16 %v2168_v59, %v2167_v43  ;;  %543 = vmatmul.mubr.f32.vlgmr.msra.gmra.mrb[0].mxu1 %v1896_v37  ;;  %1416 = vmatpush3.bf16.msra.mxu0 %v1415_v18  ;;  %v1421_v8 = vpack.c.bf16 %v1744_v60, %v1729_v50  ;;  %v2171_v24 = vand.u32 4294901760, %v1904_v34  ;;  %v2172_v34 = vld [vmem:[#allocation6_spill] sm:$0xff]  ;;  %v2173_v18 = vld [vmem:[#allocation5_spill] sm:$0xff] }
  0x4b   : > { %v1487_v63 = vpack.c.bf16 %v2170_v55, %v2169_v58  ;;  %1440 = vmatpush3.bf16.msra.mxu1 %v1611_v20  ;;  %1418 = vmatprep.subr.bf16.mxu0 %v1417_v47  ;;  %v1423_v44 = vpack.c.bf16 %v1773_v30, %v1753_v5  ;;  %v1425_v17 = vpack.c.bf16 %v1792_v3, %v1777_v51  ;;  %v2174_v47 = vld [vmem:[#allocation2_spill] sm:$0xff]  ;;  %v2180_v10 = vand.u32 4294901760, %v1801_v0 }
  0x4c   : > { %1442 = vmatprep.subr.bf16.mxu1 %v1615_v22  ;;  %785 = vmatprep.mubr.f32.mxu1 %v2171_v24  ;;  %v1427_v42 = vpack.c.bf16 %v1821_v6, %v1801_v0  ;;  %v1429_v50 = vpack.c.bf16 %v1841_v57, %v1825_v33  ;;  %v1431_v60 = vpack.c.bf16 %v1867_v13, %v1850_v54  ;;  %v2186_v0 = vand.u32 4294901760, %v1871_v35 }
  0x4d   : > { %v1433_v5 = vpack.c.bf16 %v1880_v1, %v1871_v35  ;;  %v1435_v30 = vpack.c.bf16 %v1918_v53, %v1886_v56 }
  0x4e   : > { %1420 = vmatpush3.bf16.msra.mxu0 %v1419_v12 }
  0x4f   : > { %1444 = vmatpush3.bf16.msra.mxu1 %v1628_v27  ;;  %1422 = vmatprep.subr.bf16.mxu0 %v1421_v8 }
  0x50   : > { %1446 = vmatprep.subr.bf16.mxu1 %v1645_v39 }
  0x52   : > { %1424 = vmatpush3.bf16.msra.mxu0 %v1423_v44 }
  0x53   : > { %1448 = vmatpush3.bf16.msra.mxu1 %v1656_v45  ;;  %1426 = vmatprep.subr.bf16.mxu0 %v1425_v17 }
  0x54   : > { %1450 = vmatprep.subr.bf16.mxu1 %v1684_v62 }
  0x56   : > { %1428 = vmatpush3.bf16.msra.mxu0 %v1427_v42 }
  0x57   : > { %1452 = vmatpush3.bf16.msra.mxu1 %v1709_v16  ;;  %1430 = vmatprep.subr.bf16.mxu0 %v1429_v50 }
  0x58   : > { %1454 = vmatprep.subr.bf16.mxu1 %v1727_v49 }
  0x5a   : > { %1432 = vmatpush3.bf16.msra.mxu0 %v1431_v60 }
  0x5b   : > { %1456 = vmatpush3.bf16.msra.mxu1 %v1751_v4  ;;  %1434 = vmatprep.subr.bf16.mxu0 %v1433_v5 }
  0x5c   : > { %1458 = vmatprep.subr.bf16.mxu1 %v1775_v48 }
  0x5e   : > { %1436 = vmatpush3.bf16.msra.mxu0 %v1435_v30 }
  0x5f   : > { %1460 = vmatpush3.bf16.msra.mxu1 %v1799_v11  ;;  %1470 = vmatprep.subr.bf16.mxu0 %v1469_v36  ;;  %v2177_v36 = vand.u32 4294901760, %v2172_v34 }
  0x60   : > { %1462 = vmatprep.subr.bf16.mxu1 %v1823_v7 }
  0x61   : > { %681 = vmatmul.mubr.f32.vlgmr.msra.gmra.mrb[2].mxu0 %v2172_v34 }
  0x62   : > { %1472 = vmatpush3.bf16.msra.mxu0 %v1471_v19  ;;  %955 = vmatprep.mubr.f32.mxu0 %v2173_v18  ;;  %v2179_v19 = vand.u32 4294901760, %v1792_v3 }
  0x63   : > { %1464 = vmatpush3.bf16.msra.mxu1 %v2174_v47  ;;  %1474 = vmatprep.subr.bf16.mxu0 %v1473_v2  ;;  %v2178_v2 = vand.u32 4294901760, %v1777_v51  ;;  %v2184_v51 = vand.u32 4294901760, %v1850_v54 }
  0x64   : > { %1466 = vmatprep.subr.bf16.mxu1 %v2175_v23 }
  0x66   : > { %1476 = vmatpush3.bf16.msra.mxu0 %v1475_v9 }
  0x67   : > { %1468 = vmatpush3.bf16.msra.mxu1 %v2176_v61  ;;  %1478 = vmatprep.subr.bf16.mxu0 %v1477_v41 }
  0x68   : > { %1502 = vmatprep.subr.bf16.mxu1 %v1601_v14  ;;  %v1489_v14 = vpack.c.bf16 %v2179_v19, %v2178_v2 }
  0x6a   : > { %789 = vmatmul.mubr.f32.vlgmr.msra.gmra.mrb[2].mxu1 %v2177_v36  ;;  %1480 = vmatpush3.bf16.msra.mxu0 %v1479_v29 }
  0x6b   : > { %1504 = vmatpush3.bf16.msra.mxu1 %v1611_v20  ;;  %1482 = vmatprep.subr.bf16.mxu0 %v1481_v52  ;;  %v2181_v20 = vand.u32 4294901760, %v1821_v6 }
  0x6c   : > { %1506 = vmatprep.subr.bf16.mxu1 %v1615_v22  ;;  %1059 = vmatprep.mubr.f32.mxu1 %v2173_v18  ;;  %v2182_v22 = vand.u32 4294901760, %v1825_v33  ;;  %v2188_v33 = vand.u32 4294901760, %v1886_v56 }
  0x6d   : > { %v1491_v9 = vpack.c.bf16 %v2181_v20, %v2180_v10 }
  0x6e   : > { %1484 = vmatpush3.bf16.msra.mxu0 %v1483_v40 }
  0x6f   : > { %1508 = vmatpush3.bf16.msra.mxu1 %v1628_v27  ;;  %1486 = vmatprep.subr.bf16.mxu0 %v1485_v46  ;;  %v2183_v27 = vand.u32 4294901760, %v1841_v57 }
  0x70   : > { %1510 = vmatprep.subr.bf16.mxu1 %v1645_v39  ;;  %v2185_v39 = vand.u32 4294901760, %v1867_v13 }
  0x71   : > { %v1493_v31 = vpack.c.bf16 %v2183_v27, %v2182_v22 }
  0x72   : > { %1488 = vmatpush3.bf16.msra.mxu0 %v1487_v63  ;;  %v1495_v3 = vpack.c.bf16 %v2185_v39, %v2184_v51 }
  0x73   : > { %1512 = vmatpush3.bf16.msra.mxu1 %v1656_v45  ;;  %1490 = vmatprep.subr.bf16.mxu0 %v1489_v14  ;;  %v2187_v45 = vand.u32 4294901760, %v1880_v1 }
  0x74   : > { %1514 = vmatprep.subr.bf16.mxu1 %v1684_v62  ;;  %v2189_v62 = vand.u32 4294901760, %v1918_v53 }
  0x75   : > { %v1497_v6 = vpack.c.bf16 %v2187_v45, %v2186_v0 }
  0x76   : > { %1492 = vmatpush3.bf16.msra.mxu0 %v1491_v9  ;;  %v1499_v57 = vpack.c.bf16 %v2189_v62, %v2188_v33 }
  0x77   : > { %1516 = vmatpush3.bf16.msra.mxu1 %v1709_v16  ;;  %1494 = vmatprep.subr.bf16.mxu0 %v1493_v31 }
  0x78   : > { %1518 = vmatprep.subr.bf16.mxu1 %v1727_v49  ;;  %v203_v49 = vld [vmem:[%s2099_s2] sm:$0xff] }
  0x7a   : > { %1496 = vmatpush3.bf16.msra.mxu0 %v1495_v3 }
  0x7b   : > { %1520 = vmatpush3.bf16.msra.mxu1 %v1751_v4  ;;  %1498 = vmatprep.subr.bf16.mxu0 %v1497_v6 }
  0x7c   : > { %1522 = vmatprep.subr.bf16.mxu1 %v1775_v48 }
  0x7e   : > { %1500 = vmatpush3.bf16.msra.mxu0 %v1499_v57 }
  0x7f   : > { %1524 = vmatpush3.bf16.msra.mxu1 %v1799_v11 }
  0x80   : > { %1526 = vmatprep.subr.bf16.mxu1 %v1823_v7 }
  0x81   : > { %957 = vmatmul.mubr.f32.vlgmr.msra.gmra.mrb[4].mxu0 %v1896_v37 }
  0x83   : > { %1528 = vmatpush3.bf16.msra.mxu1 %v2174_v47 }
  0x84   : > { %1530 = vmatprep.subr.bf16.mxu1 %v2175_v23 }
  0x87   : > { %1532 = vmatpush3.bf16.msra.mxu1 %v2176_v61 }
  0x8a   : > { %1061 = vmatmul.mubr.f32.vlgmr.msra.gmra.mrb[4].mxu1 %v1896_v37 }
 0x114   : > { %v1163_v35 = vpop.f32.mrb[0].mxu0 }
 0x115   : > { %v1164_v54 = vpop.f32.mrb[1].mxu0 }
 0x116   : > { %v1165_v16 = vadd.f32 %v1164_v54, %v1163_v35 }
 0x118   : > { %v313_v4 = vadd.f32 %v1165_v16, %v203_v49 }
 0x11d   : > { %v1198_v11 = vpop.f32.mrb[0].mxu1 }
 0x11e   : > { %v1199_v48 = vpop.f32.mrb[1].mxu1 }
 0x11f   : > { %v1200_v7 = vadd.f32 %v1199_v48, %v1198_v11 }
 0x121   : > { %v545_v13 = vadd.f32 %v1200_v7, %v313_v4 }
 0x134   : > { %v1233_v56 = vpop.f32.mrb[2].mxu0 }
 0x135   : > { %v1234_v1 = vpop.f32.mrb[3].mxu0 }
 0x136   : > { %v1235_v53 = vadd.f32 %v1234_v1, %v1233_v56 }
 0x138   : > { %v683_v32 = vadd.f32 %v1235_v53, %v545_v13 }
 0x13d   : > { %v1268_v41 = vpop.f32.mrb[2].mxu1 }
 0x13e   : > { %v1269_v15 = vpop.f32.mrb[3].mxu1 }
 0x13f   : > { %v1270_v37 = vadd.f32 %v1269_v15, %v1268_v41 }
 0x141   : > { %v791_v21 = vadd.f32 %v1270_v37, %v683_v32 }
 0x154   : > { %v1303_v29 = vpop.f32.mrb[4].mxu0 }
 0x155   : > { %v1304_v25 = vpop.f32.mrb[5].mxu0 }
 0x156   : > { %v1305_v26 = vadd.f32 %v1304_v25, %v1303_v29 }
 0x158   : > { %v959_v52 = vadd.f32 %v1305_v26, %v791_v21 }
 0x15d   : > { %v1338_v28 = vpop.f32.mrb[4].mxu1 }
 0x15e   : > { %v1339_v38 = vpop.f32.mrb[5].mxu1 }
 0x15f   : > { %v1340_v40 = vadd.f32 %v1339_v38, %v1338_v28 }
 0x161   : > { %v1063_v43 = vadd.f32 %v1340_v40, %v959_v52 }
 0x163   : > { %1066 = vst [vmem:[%s168_s11] sm:$0xff] %v1063_v43 }
 0x164 PF: > { %s13_s12 = sadd.s32 1, %s1547_s12  }
 0x165   : > { %p10_p4 = scmp.ge.s32.totalorder %s13_s12, 4  }
 0x167   :  { %12 = sbr.rel (!%p10_p4) target bundleno = 1 (0x1), region = 62 }

</bundles_post_ra>
